<compile_context>
chip_gen: v7x
topology: tpu7x:2x2x1
jax: 0.10.0
libtpu: 0.0.40
codegen_flags: <defaults>
</compile_context>

<pallas_src>
import jax
import jax.numpy as jnp
from jax.experimental import pallas as pl
from jax.experimental.pallas import tpu as pltpu


# ----------------------------------------------------------------------------- kernel
def mlp_kernel(x_ref, w1_ref, b1_ref, w2_ref, b2_ref, w3_ref, b3_ref, o_ref):
    """Fused 3-layer MLP for one batch tile (all f32, MXU accumulates f32)."""
    h = jnp.dot(x_ref[...], w1_ref[...], preferred_element_type=jnp.float32)
    h = jnp.maximum(h + b1_ref[...], 0.0)                       # ReLU
    h = jnp.dot(h, w2_ref[...], preferred_element_type=jnp.float32)
    h = jnp.maximum(h + b2_ref[...], 0.0)                       # ReLU
    o = jnp.dot(h, w3_ref[...], preferred_element_type=jnp.float32)
    o_ref[...] = (o + b3_ref[...]).astype(o_ref.dtype)


# ----------------------------------------------------------------------------- wrapper
def pack_params(params):
    """Kernel layout: f32 weights (in, out), f32 biases (1, out). No padding."""
    (w1, b1), (w2, b2), (w3, b3) = params
    f32 = jnp.float32
    return dict(
        w1=w1.astype(f32), b1=b1.reshape(1, -1).astype(f32),
        w2=w2.astype(f32), b2=b2.reshape(1, -1).astype(f32),
        w3=w3.astype(f32), b3=b3.reshape(1, -1).astype(f32),
        n_cats=w3.shape[1])


def _choose_tb(B, block_batch):
    """Pick a batch tile: multiple of 8 (or == B), <= block_batch, preferring
    no batch padding and >= 2 grid steps (v7x megacore) when B permits."""
    block_batch = max(8, (block_batch // 8) * 8)
    if B <= block_batch:
        half = B // 2
        if B >= 16 and half % 8 == 0:
            return half                     # 2 grid steps, no padding
        return B                            # block == full dim is always legal
    # Streaming case: prefer a large tile that divides B exactly (no jnp.pad).
    for tb in range(block_batch, max(7, block_batch // 2 - 1), -8):
        if B % tb == 0:
            return tb
    return block_batch                      # ragged tail -> padded below


def net_forward(x, packed, *, block_batch=2048):
    """x: (B, F) float32. Returns (B, n_cats) float32."""
    x = x.astype(jnp.float32)
    B, F = x.shape
    n_cats = packed["n_cats"]
    h1 = packed["w1"].shape[1]
    h2 = packed["w2"].shape[1]

    tb = _choose_tb(B, block_batch)
    b_pad = pl.cdiv(B, tb) * tb
    xp = x if b_pad == B else jnp.pad(x, ((0, b_pad - B), (0, 0)))
    grid = (b_pad // tb,)

    def resident(a):
        # Full array, same block every grid step -> stays VMEM-resident, no re-DMA.
        return pl.BlockSpec(a.shape, lambda i: (0,) * a.ndim)

    # Bytes dominated by x read + out write; weights/biases are tiny and resident.
    param_bytes = 4 * sum(int(packed[k].size)
                          for k in ("w1", "b1", "w2", "b2", "w3", "b3"))
    cost = pl.CostEstimate(
        flops=2 * b_pad * (F * h1 + h1 * h2 + h2 * n_cats),
        transcendentals=0,
        bytes_accessed=4 * b_pad * (F + n_cats) + param_bytes)

    out = pl.pallas_call(
        mlp_kernel,
        out_shape=jax.ShapeDtypeStruct((b_pad, n_cats), jnp.float32),
        grid=grid,
        in_specs=[
            pl.BlockSpec((tb, F), lambda i: (i, 0)),            # x: tiled over batch
            resident(packed["w1"]), resident(packed["b1"]),
            resident(packed["w2"]), resident(packed["b2"]),
            resident(packed["w3"]), resident(packed["b3"]),
        ],
        out_specs=pl.BlockSpec((tb, n_cats), lambda i: (i, 0)),  # un-padded output
        compiler_params=pltpu.CompilerParams(
            dimension_semantics=("parallel",)),                  # megacore on v7x
        cost_estimate=cost,
    )(xp, packed["w1"], packed["b1"], packed["w2"], packed["b2"],
      packed["w3"], packed["b3"])

    return out if b_pad == B else out[:B]


# ----------------------------------------------------------------------------- init / reference
def init_params(key, n_neurons, n_cats):
    """PyTorch-style Linear init: U(-1/sqrt(fan_in), 1/sqrt(fan_in)); W stored (in, out)."""
    dims = list(n_neurons) + [n_cats]       # e.g. [32, 32, 32, 8] -> 3 Linear layers
    params = []
    for i in range(len(dims) - 1):
        n_in, n_out = dims[i], dims[i + 1]
        key, kw, kb = jax.random.split(key, 3)
        bound = 1.0 / (n_in ** 0.5)
        w = jax.random.uniform(kw, (n_in, n_out), jnp.float32, -bound, bound)
        b = jax.random.uniform(kb, (1, n_out), jnp.float32, -bound, bound)
        params.append((w, b))
    return params


def reference_forward_f32(x, params):
    """Plain-JAX f32 reference matching the PyTorch forward."""
    (w1, b1), (w2, b2), (w3, b3) = params
    h = jnp.maximum(x @ w1 + b1, 0.0)
    h = jnp.maximum(h @ w2 + b2, 0.0)
    return h @ w3 + b3


# ----------------------------------------------------------------------------- main
if __name__ == "__main__":
    # Small shapes consistent with the module: n_neurons=[32,32,32], n_cats=8.
    # (The first Linear consumes n_neurons[0] features; input_size is unused in
    # the reference module.)
    batch, hidden, n_cats = 32, 32, 8
    n_neurons = [hidden, hidden, hidden]

    key = jax.random.PRNGKey(0)
    key, kx = jax.random.split(key)
    x = jax.random.normal(kx, (batch, n_neurons[0]), jnp.float32)

    params = init_params(key, n_neurons, n_cats)
    packed = pack_params(params)

    # With B=32 the adaptive tiler picks tb=16 -> grid=(2,), exercising both the
    # software pipeline and (on v7x) both TensorCores; no batch padding occurs.
    out = net_forward(x, packed)
    out = jax.block_until_ready(out)

    ref_f32 = reference_forward_f32(x, params)

    assert out.shape == (batch, n_cats)
    assert jnp.allclose(out, ref_f32, atol=1e-5, rtol=1e-5), "mismatch vs f32 reference"

    # TODO(synk): if drate ever becomes nonzero (training), add dropout masking
    # via pltpu.prng_seed / pltpu.prng_random_bits; this kernel assumes p=0.

    print("KERNEL_OK")
</pallas_src>

<mosaic_0001>
module attributes {stable_mosaic.version = 11 : i64} {
  func.func @mlp_kernel(%arg0: i32, %arg1: memref<16x32xf32, #tpu.memory_space<vmem>>, %arg2: memref<32x32xf32, #tpu.memory_space<vmem>>, %arg3: memref<1x32xf32, #tpu.memory_space<vmem>>, %arg4: memref<32x32xf32, #tpu.memory_space<vmem>>, %arg5: memref<1x32xf32, #tpu.memory_space<vmem>>, %arg6: memref<32x8xf32, #tpu.memory_space<vmem>>, %arg7: memref<1x8xf32, #tpu.memory_space<vmem>>, %arg8: memref<16x8xf32, #tpu.memory_space<vmem>>) attributes {dimension_semantics = [#tpu.dimension_semantics<parallel>], iteration_bounds = array<i64: 2>, scalar_prefetch = 0 : i64, scratch_operands = 0 : i64, tpu.core_type = #tpu.core_type<tc>, window_params = [{transform_indices = @transform_0, window_bounds = array<i64: 16, 32>}, {pipeline_mode = #tpu.pipeline_mode<synchronous>, transform_indices = @transform_1, window_bounds = array<i64: 32, 32>}, {pipeline_mode = #tpu.pipeline_mode<synchronous>, transform_indices = @transform_2, window_bounds = array<i64: 1, 32>}, {pipeline_mode = #tpu.pipeline_mode<synchronous>, transform_indices = @transform_3, window_bounds = array<i64: 32, 32>}, {pipeline_mode = #tpu.pipeline_mode<synchronous>, transform_indices = @transform_4, window_bounds = array<i64: 1, 32>}, {pipeline_mode = #tpu.pipeline_mode<synchronous>, transform_indices = @transform_5, window_bounds = array<i64: 32, 8>}, {pipeline_mode = #tpu.pipeline_mode<synchronous>, transform_indices = @transform_6, window_bounds = array<i64: 1, 8>}, {transform_indices = @transform_7, window_bounds = array<i64: 16, 8>}]} {
    %c0 = arith.constant 0 : index
    %c0_0 = arith.constant 0 : index
    %0 = vector.load %arg1[%c0, %c0_0] : memref<16x32xf32, #tpu.memory_space<vmem>>, vector<16x32xf32>
    %c0_1 = arith.constant 0 : index
    %c0_2 = arith.constant 0 : index
    %1 = vector.load %arg2[%c0_1, %c0_2] : memref<32x32xf32, #tpu.memory_space<vmem>>, vector<32x32xf32>
    %cst = arith.constant dense<0.000000e+00> : vector<16x32xf32>
    %2 = tpu.matmul %0, %1, %cst {dimension_numbers = #tpu.dot_dimension_numbers<[1], [0], [0], [1], [0, 0, 1, 1], [], []>} : vector<16x32xf32>, vector<32x32xf32>, vector<16x32xf32> -> vector<16x32xf32>
    %c0_3 = arith.constant 0 : index
    %c0_4 = arith.constant 0 : index
    %3 = vector.load %arg3[%c0_3, %c0_4] : memref<1x32xf32, #tpu.memory_space<vmem>>, vector<1x32xf32>
    %4 = vector.broadcast %3 : vector<1x32xf32> to vector<16x32xf32>
    %5 = arith.addf %2, %4 : vector<16x32xf32>
    %cst_5 = arith.constant 0.000000e+00 : f32
    %6 = vector.broadcast %cst_5 : f32 to vector<16x32xf32>
    %7 = arith.maximumf %5, %6 : vector<16x32xf32>
    %c0_6 = arith.constant 0 : index
    %c0_7 = arith.constant 0 : index
    %8 = vector.load %arg4[%c0_6, %c0_7] : memref<32x32xf32, #tpu.memory_space<vmem>>, vector<32x32xf32>
    %cst_8 = arith.constant dense<0.000000e+00> : vector<16x32xf32>
    %9 = tpu.matmul %7, %8, %cst_8 {dimension_numbers = #tpu.dot_dimension_numbers<[1], [0], [0], [1], [0, 0, 1, 1], [], []>} : vector<16x32xf32>, vector<32x32xf32>, vector<16x32xf32> -> vector<16x32xf32>
    %c0_9 = arith.constant 0 : index
    %c0_10 = arith.constant 0 : index
    %10 = vector.load %arg5[%c0_9, %c0_10] : memref<1x32xf32, #tpu.memory_space<vmem>>, vector<1x32xf32>
    %11 = vector.broadcast %10 : vector<1x32xf32> to vector<16x32xf32>
    %12 = arith.addf %9, %11 : vector<16x32xf32>
    %cst_11 = arith.constant 0.000000e+00 : f32
    %13 = vector.broadcast %cst_11 : f32 to vector<16x32xf32>
    %14 = arith.maximumf %12, %13 : vector<16x32xf32>
    %c0_12 = arith.constant 0 : index
    %c0_13 = arith.constant 0 : index
    %15 = vector.load %arg6[%c0_12, %c0_13] : memref<32x8xf32, #tpu.memory_space<vmem>>, vector<32x8xf32>
    %cst_14 = arith.constant dense<0.000000e+00> : vector<16x8xf32>
    %16 = tpu.matmul %14, %15, %cst_14 {dimension_numbers = #tpu.dot_dimension_numbers<[1], [0], [0], [1], [0, 0, 1, 1], [], []>} : vector<16x32xf32>, vector<32x8xf32>, vector<16x8xf32> -> vector<16x8xf32>
    %c0_15 = arith.constant 0 : index
    %c0_16 = arith.constant 0 : index
    %17 = vector.load %arg7[%c0_15, %c0_16] : memref<1x8xf32, #tpu.memory_space<vmem>>, vector<1x8xf32>
    %18 = vector.broadcast %17 : vector<1x8xf32> to vector<16x8xf32>
    %19 = arith.addf %16, %18 : vector<16x8xf32>
    %c0_17 = arith.constant 0 : index
    %c0_18 = arith.constant 0 : index
    %20 = vector.load %arg8[%c0_17, %c0_18] : memref<16x8xf32, #tpu.memory_space<vmem>>, vector<16x8xf32>
    tpu.vector_store %arg8[%c0_17, %c0_18], %19 {strides = array<i32>} : memref<16x8xf32, #tpu.memory_space<vmem>>, vector<16x8xf32>,
    return
  }
  func.func @transform_0(%arg0: i32) -> (i32, i32) {
    %c0_i32 = arith.constant 0 : i32
    %c0_i32_0 = arith.constant 0 : i32
    return %arg0, %c0_i32 : i32, i32
  }
  func.func @transform_1(%arg0: i32) -> (i32, i32) {
    %c0_i32 = arith.constant 0 : i32
    %c0_i32_0 = arith.constant 0 : i32
    %c0_i32_1 = arith.constant 0 : i32
    return %c0_i32, %c0_i32_0 : i32, i32
  }
  func.func @transform_2(%arg0: i32) -> (i32, i32) {
    %c0_i32 = arith.constant 0 : i32
    %c0_i32_0 = arith.constant 0 : i32
    %c0_i32_1 = arith.constant 0 : i32
    return %c0_i32, %c0_i32_0 : i32, i32
  }
  func.func @transform_3(%arg0: i32) -> (i32, i32) {
    %c0_i32 = arith.constant 0 : i32
    %c0_i32_0 = arith.constant 0 : i32
    %c0_i32_1 = arith.constant 0 : i32
    return %c0_i32, %c0_i32_0 : i32, i32
  }
  func.func @transform_4(%arg0: i32) -> (i32, i32) {
    %c0_i32 = arith.constant 0 : i32
    %c0_i32_0 = arith.constant 0 : i32
    %c0_i32_1 = arith.constant 0 : i32
    return %c0_i32, %c0_i32_0 : i32, i32
  }
  func.func @transform_5(%arg0: i32) -> (i32, i32) {
    %c0_i32 = arith.constant 0 : i32
    %c0_i32_0 = arith.constant 0 : i32
    %c0_i32_1 = arith.constant 0 : i32
    return %c0_i32, %c0_i32_0 : i32, i32
  }
  func.func @transform_6(%arg0: i32) -> (i32, i32) {
    %c0_i32 = arith.constant 0 : i32
    %c0_i32_0 = arith.constant 0 : i32
    %c0_i32_1 = arith.constant 0 : i32
    return %c0_i32, %c0_i32_0 : i32, i32
  }
  func.func @transform_7(%arg0: i32) -> (i32, i32) {
    %c0_i32 = arith.constant 0 : i32
    %c0_i32_0 = arith.constant 0 : i32
    return %arg0, %c0_i32 : i32, i32
  }
}

</mosaic_0001>

<bundles_post_ra>
// kernel: tpu_custom_call.1
= control target key start
LH: loop header
LB: loop body
LE: loop exit
PB: predicated region body
PF: predicated region fallthrough
CT: control target
= control target key end

     0   :  { %12 = vsyncpa [#allocation3], 0  ;;  %s1052_s0 = inlined_call_operand.vmem [shape: f32[32,32], index: 0, kind: input, shape index: {}]   ;;  %s1053_s1 = inlined_call_operand.hbm [shape: f32[32,32], index: 1, kind: input, shape index: {}]   ;;  %s1054_s2 = inlined_call_operand.vmem [shape: f32[1,32], index: 2, kind: input, shape index: {}]   ;;  %s1055_s3 = inlined_call_operand.hbm [shape: f32[32,32], index: 3, kind: input, shape index: {}]   ;;  %s1056_s4 = inlined_call_operand.vmem [shape: f32[1,32], index: 4, kind: input, shape index: {}]   ;;  %s1057_s5 = inlined_call_operand.vmem [shape: f32[32,8], index: 5, kind: input, shape index: {}]   ;;  %s1058_s6 = inlined_call_operand.vmem [shape: f32[1,8], index: 6, kind: input, shape index: {}]   ;;  %s1059_s7 = inlined_call_operand.vmem [shape: f32[32,8], index: 7, kind: output, shape index: {}]  }
   0x1   :  { %13 = vsyncpa [#allocation5], 0  ;;  %s922_s24 = smov 0  }
   0x2 LB: > { %s676_s25 = sadd.s32 4294967295, %s876_s24   ;;  %p678_p0 = scmp.ge.s32.totalorder %s876_s24, 1  ;;  %s876_s24 = sphi %s922_s24, %s19_s24  }
   0x3   : > { %p202_p1 = scmp.lt.s32.totalorder %s876_s24, 3  ;;  %s878_s26 = smov [#allocation2]  }
   0x4   : > { %s214_s27 = sshll.u32 %s878_s26, 4  ;;  %p936_p3 = scmp.eq.s32.totalorder %s676_s25, 0  ;;  %s215_s27 = int_to_ptr.vmem [resolvable:$true] %s214_s27 }
   0x5   : > { %p930_p2 = pnand %p678_p0, %p202_p1  ;;  %s879_s30 = smov [#allocation4]  }
   0x6   : > { %s1064_s29 = scalar_select %p936_p3, 1, 0 }
   0x7   : > { %s1063_s28 = scalar_select %p930_p2, 1, 0 }
   0x8   : > { %p783_p4 = pneg %p930_p2  ;;  %s230_s8 = sshll.u32 %s879_s30, 4  ;;  %s948_s8 = int_to_ptr.vmem [resolvable:$true] %s230_s8 }
   0x9   : > { %s806_s12 = scalar_lea.hbm %s1053_s1, 512 }
   0xa   : > { %p944_p5 = pnand %p936_p3, %p783_p4  ;;  %p807_p6 = scmp.ne.s32.totalorder %s1053_s1, %s806_s12 }
   0xb   : > { %p813_p10 = scmp.lt.u32.totalorder %s806_s12, %s1053_s1 }
   0xc   : > { %p808_p7 = pneg %p944_p5 }
   0xe   : > { %p809_p8 = pnand %p808_p7, %p807_p6 }
  0x10   : > { %p810_p9 = pneg %p809_p8 }
  0x12   : > { %p815_p11 = pnand %p813_p10, %p810_p9 }
  0x14   : > { %818 = shalt.err (!%p815_p11)
}
  0x15   : > { %s819_s17 = scalar_lea.vmem %s215_s27, 512  ;;  %p827_p1 = scmp.lt.s32.totalorder %s215_s27, %s215_s27 }
  0x16   : > { %p820_p12 = scmp.ne.s32.totalorder %s215_s27, %s819_s17  ;;  %p828_p4 = scmp.lt.s32.totalorder %s819_s17, %s819_s17 }
  0x18   : > { %p822_p13 = pnand %p820_p12, %p808_p7  ;;  %p829_p3 = por %p828_p4, %p827_p1 }
  0x1a   : > { %p823_p0 = pneg %p822_p13 }
  0x1c   : > { %p830_p2 = pnand %p829_p3, %p823_p0 }
  0x1e   : > { %833 = shalt.err (!%p830_p2)
}
  0x1f   : > { %s880_s18 = smov 128   ;;  %s881_s19 = smov 8  }
  0x20   : > { %786 = dma.hbm_to_vmem [thread:$0]  (!%p944_p5), %s1053_s1, 512, %s215_s27, [#allocation3], %s880_s18, %s880_s18, %s881_s19  }
  0x21   : > { %s834_s26 = scalar_lea.hbm %s1055_s3, 512 }
  0x22   : > { %p835_p6 = scmp.ne.s32.totalorder %s1055_s3, %s834_s26  ;;  %p841_p8 = scmp.lt.u32.totalorder %s834_s26, %s1055_s3 }
  0x24   : > { %p837_p2 = pnand %p835_p6, %p808_p7 }
  0x26   : > { %p838_p3 = pneg %p837_p2 }
  0x28   : > { %p843_p9 = pnand %p841_p8, %p838_p3 }
  0x2a   : > { %846 = shalt.err (!%p843_p9)
}
  0x2b   : > { %s847_s27 = scalar_lea.vmem %s948_s8, 512  ;;  %p855_p13 = scmp.lt.s32.totalorder %s948_s8, %s948_s8 }
  0x2c   : > { %p848_p10 = scmp.ne.s32.totalorder %s948_s8, %s847_s27  ;;  %p856_p0 = scmp.lt.s32.totalorder %s847_s27, %s847_s27 }
  0x2e   : > { %p850_p11 = pnand %p848_p10, %p808_p7  ;;  %p857_p1 = por %p856_p0, %p855_p13 }
  0x30   : > { %p851_p12 = pneg %p850_p11 }
  0x32   : > { %p858_p4 = pnand %p857_p1, %p851_p12 }
  0x34   : > { %861 = shalt.err (!%p858_p4)
}
  0x35   : > { %789 = dma.hbm_to_vmem [thread:$0]  (!%p944_p5), %s1055_s3, 512, %s948_s8, [#allocation5], %s880_s18, %s880_s18, %s881_s19  }
  0x36   : > { %p1066_p6 = scmp.ne.s32.totalorder %s1063_s28, 0 }
  0x37   : > { %p1067_p2 = scmp.ne.s32.totalorder (!%p1066_p6), %s1064_s29, 0 }
  0x38   : > { %264 = sbr.rel (%p1066_p6) target bundleno = 729 (0x2d9), region = 48 }
  0x3f   : > { %867 = dma.done.wait (%p1067_p2), [#allocation3], 512  }
  0x40   : > { %869 = vsyncadd (%p1067_p2), [#allocation3], 4294966784 }
  0x41   : > { %871 = dma.done.wait (%p1067_p2), [#allocation5], 512  }
  0x42   : > { %873 = vsyncadd (%p1067_p2), [#allocation5], 4294966784  ;;  %s685_s9 = sshll.u32 %s676_s25, 1  ;;  %vm325_vm0 = vcmask 261120   ;;  %v314_v0 = vld [vmem:[#allocation2] sm:$0xff]  ;;  %v315_v1 = vld [vmem:[#allocation2 + $0x8] sm:$0xff] }
  0x43   : > { %p301_p7 = scmp.lt.s32.totalorder %s685_s9, 3  ;;  %v316_v2 = vld [vmem:[#allocation2 + $0x10] sm:$0xff]  ;;  %v751_v3 = vpack.c.bf16 %v315_v1, %v314_v0  ;;  %v317_v4 = vld [vmem:[#allocation2 + $0x18] sm:$0xff]  ;;  %v409_v7 = vld [vmem:[#allocation4] sm:$0xff]  ;;  %vm595_vm1 = vcmask 64512  }
  0x44   : > { %v755_v6 = vpack.c.bf16 %v317_v4, %v316_v2  ;;  %v410_v8 = vld [vmem:[#allocation4 + $0x8] sm:$0xff]  ;;  %v411_v11 = vld [vmem:[#allocation4 + $0x10] sm:$0xff]  ;;  %v412_v12 = vld [vmem:[#allocation4 + $0x18] sm:$0xff] }
  0x45   : > { %s1069_s9 = smov (!%p301_p7, %s685_s9), 3  ;;  %752 = vmatprep.subr.bf16.mxu0 %v751_v3  ;;  %v759_v9 = vpack.c.bf16 %v410_v8, %v409_v7  ;;  %v763_v13 = vpack.c.bf16 %v412_v12, %v411_v11  ;;  %v503_v14 = vld [vmem:[%s1057_s5] sm:$0xff]  ;;  %v504_v15 = vld [vmem:[%s1057_s5 + $0x8] sm:$0xff]  ;;  %v505_v24 = vld [vmem:[%s1057_s5 + $0x10] sm:$0xff] }
  0x46   : > { %s686_s28 = sshll.u32 %s1069_s9, 3  ;;  %754 = vmatpush3.bf16.msra.mxu0 %v751_v3  ;;  %v767_v16 = vpack.c.bf16 %v504_v15, %v503_v14  ;;  %v689_v17 = vld [vmem:[%s1054_s2] ss:$0 sm:$0xff]  ;;  %v506_v25 = vld [vmem:[%s1057_s5 + $0x18] sm:$0xff] }
  0x47   : > { %s304_s16 = scalar_lea.vmem %s1052_s0, %s686_s28  ;;  %756 = vmatprep.subr.bf16.mxu0 %v755_v6  ;;  %760 = vmatprep.subr.bf16.mxu1 %v759_v9  ;;  %v771_v26 = vpack.c.bf16 %v506_v25, %v505_v24  ;;  %v692_v27 = vld [vmem:[%s1056_s4] ss:$0 sm:$0xff]  ;;  %s310_s14 = scalar_lea.vmem %s1059_s7, %s686_s28 }
  0x48   : > { %v312_v5 = vld [vmem:[%s304_s16] sm:$0xff]  ;;  %762 = vmatpush3.bf16.msra.mxu1 %v759_v9  ;;  %v313_v10 = vld [vmem:[%s304_s16 + $0x8] sm:$0xff] }
  0x49   : > { %726 = vmatprep.mubr.msk.f32.mxu0 %vm325_vm0, %v312_v5  ;;  %764 = vmatprep.subr.bf16.mxu1 %v763_v13  ;;  %v695_v34 = vld [vmem:[%s1058_s6] ss:$0 sm:$0xff] }
  0x4a   : > { %758 = vmatpush3.bf16.msra.mxu0 %v755_v6 }
  0x4b   : > { %768 = vmatprep.subr.bf16.mxu0 %v767_v16 }
  0x4c   : > { %766 = vmatpush3.bf16.msra.mxu1 %v763_v13 }
  0x4d   : > { %727 = vmatmul.mubr.msk.f32.vlgmr.msra.gmra.mrb[0].mxu0 %vm325_vm0, %v313_v10 }
  0x4e   : > { %770 = vmatpush3.bf16.msra.mxu0 %v767_v16 }
  0x4f   : > { %772 = vmatprep.subr.bf16.mxu0 %v771_v26 }
  0x52   : > { %774 = vmatpush3.bf16.msra.mxu0 %v771_v26 }
 0x120   : > { %v728_v18 = vpop.f32.mrb[0].mxu0 }
 0x121   : > { %v404_v19 = vadd.f32 %v728_v18, %v689_v17  ;;  %v398_v20 = vpop.f32.mrb[1].mxu0 }
 0x122   : > { %v399_v21 = vadd.f32 %v689_v17, %v398_v20 }
 0x123   : > { %v408_v23 = vmax.f32 %v404_v19, 0.0 }
 0x124   : > { %v407_v22 = vmax.f32 %v399_v21, 0.0 }
 0x126   : > { %737 = vmatprep.mubr.msk.f32.mxu1 %vm325_vm0, %v407_v22 }
 0x127   : > { %738 = vmatmul.mubr.msk.f32.vlgmr.msra.gmra.mrb[0].mxu1 %vm325_vm0, %v408_v23 }
 0x1fa   : > { %v739_v28 = vpop.f32.mrb[0].mxu1 }
 0x1fb   : > { %v498_v29 = vadd.f32 %v739_v28, %v692_v27  ;;  %v492_v30 = vpop.f32.mrb[1].mxu1 }
 0x1fc   : > { %v493_v31 = vadd.f32 %v692_v27, %v492_v30 }
 0x1fd   : > { %v502_v33 = vmax.f32 %v498_v29, 0.0 }
 0x1fe   : > { %v501_v32 = vmax.f32 %v493_v31, 0.0 }
 0x200   : > { %748 = vmatprep.mubr.msk.f32.mxu0 %vm325_vm0, %v501_v32 }
 0x201   : > { %749 = vmatmul.mubr.msk.f32.vlgmr.msra.gmra.mrb[2].mxu0 %vm325_vm0, %v502_v33 }
 0x2d4   : > { %v750_v35 = vpop.f32.mrb[2].mxu0 }
 0x2d5   : > { %v586_v36 = vpop.f32.mrb[3].mxu0  ;;  %v592_v38 = vadd.f32 %v750_v35, %v695_v34 }
 0x2d6   : > { %v587_v37 = vadd.f32 %v695_v34, %v586_v36 }
 0x2d7   : > { %597 = vst.msk [vmem:[%s310_s14 + $0x8] sm:$0xff] %vm595_vm1, %v592_v38 }
 0x2d8   : > { %596 = vst.msk [vmem:[%s310_s14] sm:$0xff] %vm595_vm1, %v587_v37 }
 0x2d9 PF: > { %s19_s24 = sadd.s32 1, %s876_s24  }
 0x2da   : > { %p16_p5 = scmp.ge.s32.totalorder %s19_s24, 4  }
 0x2dc   :  { %18 = sbr.rel (!%p16_p5) target bundleno = 2 (0x2), region = 87 }
 0x2e3   :  { %620 = vsyncpa [#allocation3], 1 }
 0x2e4   :  { %622 = vsyncpa [#allocation3 + $0x1], 1 }
 0x2e5   :  { %623 = vsyncpa [#allocation5], 1 }

</bundles_post_ra>
